<compile_context>
chip_gen: v5e
topology: v5e:2x2
jax: 0.10.0
libtpu: 0.0.40
codegen_flags: <defaults>
</compile_context>

<pallas_src>
import functools

import jax
import jax.numpy as jnp
from jax.experimental import pallas as pl
from jax.experimental.pallas import tpu as pltpu


# --------------------------------------------------------------------------------------
# Fused TinyDiffuser MLP kernel: time-normalize + (implicit concat) + Linear + ReLU + Linear
# --------------------------------------------------------------------------------------
def _tiny_diffuser_kernel(flat_ref, steps_ref, w1_ref, w2_ref, o_ref,
                          *, max_steps, flat_dim, hidden):
    flat = flat_ref[...]                                            # (TB, D) f32
    # time = num_steps / max_steps, shape (TB, 1) — true division (matches PyTorch).
    time = steps_ref[...].astype(jnp.float32) / jnp.float32(max_steps)

    # Static slices into the packed Linear1 parameters (views, no extra DMA):
    w1x = w1_ref[:flat_dim, :]                                      # (D, hidden)
    w1t = w1_ref[flat_dim:flat_dim + 1, :]                          # (1, hidden)
    b1 = w1_ref[flat_dim + 1:flat_dim + 2, :]                       # (1, hidden)

    # Linear1 on the concatenated input, without materializing the concat:
    #   [flat | time] @ [[W1x], [W1t]] = flat @ W1x + time * W1t
    h = jnp.dot(flat, w1x, preferred_element_type=jnp.float32)      # MXU, (TB, hidden)
    h = h + time * w1t                                              # (TB,1)*(1,hidden) broadcast
    h = h + b1
    h = jnp.maximum(h, 0.0)                                         # ReLU (VPU)

    # Packed Linear2 parameters.
    w2 = w2_ref[:hidden, :]                                         # (hidden, D)
    b2 = w2_ref[hidden:hidden + 1, :]                               # (1, D)

    out = jnp.dot(h, w2, preferred_element_type=jnp.float32)        # MXU, (TB, D)
    out = out + b2
    o_ref[...] = out.astype(o_ref.dtype)


def tiny_diffuser_forward(params, images, num_steps, *, max_steps):
    """images: (B, C, H, W); num_steps: (B,) int. Returns (B, C, H, W) noise prediction."""
    B, C, H, W = images.shape
    flat_dim = C * H * W
    w1_pack = params["w1_pack"]                                     # (flat_dim + 2, hidden)
    w2_pack = params["w2_pack"]                                     # (hidden + 1, flat_dim)
    hidden = w1_pack.shape[1]

    flat = images.reshape(B, flat_dim)                              # 'b c h w -> b (c h w)' (glue)
    steps = num_steps.reshape(B, 1).astype(jnp.int32)

    # Batch tile: whole batch as one block when small; tile (and parallelize across
    # TensorCores on v7x) when B grows, so the footprint never outruns VMEM.
    TB = B if B <= 256 else 256
    grid = (pl.cdiv(B, TB),)

    kernel = functools.partial(_tiny_diffuser_kernel, max_steps=max_steps,
                               flat_dim=flat_dim, hidden=hidden)

    bytes_accessed = 4 * (B * flat_dim          # flat in
                          + B                   # steps in
                          + w1_pack.size        # packed Linear1
                          + w2_pack.size        # packed Linear2
                          + B * flat_dim)       # output
    cost = pl.CostEstimate(flops=4 * B * flat_dim * hidden,
                           transcendentals=0,
                           bytes_accessed=bytes_accessed)

    vmem = pltpu.MemorySpace.VMEM
    out_flat = pl.pallas_call(
        kernel,
        out_shape=jax.ShapeDtypeStruct((B, flat_dim), images.dtype),
        grid=grid,
        in_specs=[
            pl.BlockSpec((TB, flat_dim), lambda i: (i, 0), memory_space=vmem),
            pl.BlockSpec((TB, 1), lambda i: (i, 0), memory_space=vmem),
            pl.BlockSpec((flat_dim + 2, hidden), lambda i: (0, 0), memory_space=vmem),
            pl.BlockSpec((hidden + 1, flat_dim), lambda i: (0, 0), memory_space=vmem),
        ],
        out_specs=pl.BlockSpec((TB, flat_dim), lambda i: (i, 0), memory_space=vmem),
        compiler_params=pltpu.CompilerParams(dimension_semantics=("parallel",)),
        cost_estimate=cost,
    )(flat, steps, w1_pack, w2_pack)

    return out_flat.reshape(B, C, H, W)                             # 'b (c h w) -> b c h w' (glue)


# --------------------------------------------------------------------------------------
# Deterministic synthetic parameter initialization (shapes from TinyDiffuser.__init__).
# Weights are stored (in, out) so the kernel multiplies directly (x @ W); this is the
# transpose of PyTorch's nn.Linear (out, in) layout.  Parameters are packed:
#   w1_pack rows: [0..flat_dim-1] = W1x, [flat_dim] = W1t (time column), [flat_dim+1] = b1
#   w2_pack rows: [0..hidden-1]   = W2,  [hidden]   = b2
# --------------------------------------------------------------------------------------
def _normal(key, shape, scale=0.1):
    return scale * jax.random.normal(key, shape, dtype=jnp.float32)


def init_tiny_diffuser_params(key, flat_dim, hidden_size):
    k1, k2, k3, k4, k5 = jax.random.split(key, 5)
    w1x = _normal(k1, (flat_dim, hidden_size))
    w1t = _normal(k2, (1, hidden_size))
    b1 = _normal(k3, (1, hidden_size))
    w2 = _normal(k4, (hidden_size, flat_dim))
    b2 = _normal(k5, (1, flat_dim))
    return {
        "w1_pack": jnp.concatenate([w1x, w1t, b1], axis=0),   # (flat_dim + 2, hidden)
        "w2_pack": jnp.concatenate([w2, b2], axis=0),          # (hidden + 1, flat_dim)
    }


# Pure-JAX reference of the same forward pass, for correctness checking.
def _reference_forward(params, images, num_steps, *, max_steps):
    B, C, H, W = images.shape
    flat_dim = C * H * W
    hidden = params["w1_pack"].shape[1]
    w1x = params["w1_pack"][:flat_dim]
    w1t = params["w1_pack"][flat_dim:flat_dim + 1]
    b1 = params["w1_pack"][flat_dim + 1:flat_dim + 2]
    w2 = params["w2_pack"][:hidden]
    b2 = params["w2_pack"][hidden:hidden + 1]
    flat = images.reshape(B, flat_dim)
    time = (num_steps.astype(jnp.float32) / jnp.float32(max_steps)).reshape(B, 1)
    x = jnp.concatenate([flat, time], axis=1)
    w1 = jnp.concatenate([w1x, w1t], axis=0)
    h = jnp.maximum(x @ w1 + b1, 0.0)
    return (h @ w2 + b2).reshape(B, C, H, W)


if __name__ == "__main__":
    # TinyDiffuserConfig defaults: image_shape=(3, 4, 5), hidden_size=128, max_steps=100
    B = 2
    image_shape = (3, 4, 5)
    hidden_size = 128
    max_steps = 100
    C, H, W = image_shape
    flat_dim = C * H * W

    key = jax.random.PRNGKey(0)
    kx, kn, kp = jax.random.split(key, 3)

    images = jax.random.normal(kx, (B, C, H, W), jnp.float32)            # (B, C, H, W)
    num_steps = jax.random.randint(kn, (B,), 0, max_steps, jnp.int32)    # (B,)
    params = init_tiny_diffuser_params(kp, flat_dim, hidden_size)

    fwd = jax.jit(functools.partial(tiny_diffuser_forward, max_steps=max_steps))
    out = fwd(params, images, num_steps)
    jax.block_until_ready(out)

    assert out.shape == (B, C, H, W), out.shape
    assert out.dtype == jnp.float32
    assert bool(jnp.all(jnp.isfinite(out)))

    ref = _reference_forward(params, images, num_steps, max_steps=max_steps)
    assert bool(jnp.allclose(out, ref, atol=1e-5, rtol=1e-5)), \
        float(jnp.max(jnp.abs(out - ref)))

    print("KERNEL_OK")
</pallas_src>

<mosaic_0001>
module attributes {stable_mosaic.version = 11 : i64} {
  func.func @_tiny_diffuser_kernel(%arg0: i32, %arg1: memref<2x60xf32, #tpu.memory_space<vmem>>, %arg2: memref<2x1xi32, #tpu.memory_space<vmem>>, %arg3: memref<62x128xf32, #tpu.memory_space<vmem>>, %arg4: memref<129x60xf32, #tpu.memory_space<vmem>>, %arg5: memref<2x60xf32, #tpu.memory_space<vmem>>) attributes {dimension_semantics = [#tpu.dimension_semantics<parallel>], iteration_bounds = array<i64: 1>, scalar_prefetch = 0 : i64, scratch_operands = 0 : i64, tpu.core_type = #tpu.core_type<tc>, window_params = [{transform_indices = @transform_0, window_bounds = array<i64: 2, 60>}, {transform_indices = @transform_1, window_bounds = array<i64: 2, 1>}, {pipeline_mode = #tpu.pipeline_mode<synchronous>, transform_indices = @transform_2, window_bounds = array<i64: 62, 128>}, {pipeline_mode = #tpu.pipeline_mode<synchronous>, transform_indices = @transform_3, window_bounds = array<i64: 129, 60>}, {transform_indices = @transform_4, window_bounds = array<i64: 2, 60>}]} {
    %c0 = arith.constant 0 : index
    %c0_0 = arith.constant 0 : index
    %0 = vector.load %arg1[%c0, %c0_0] : memref<2x60xf32, #tpu.memory_space<vmem>>, vector<2x60xf32>
    %c0_1 = arith.constant 0 : index
    %c0_2 = arith.constant 0 : index
    %1 = vector.load %arg2[%c0_1, %c0_2] : memref<2x1xi32, #tpu.memory_space<vmem>>, vector<2x1xi32>
    %2 = arith.sitofp %1 : vector<2x1xi32> to vector<2x1xf32>
    %cst = arith.constant 1.000000e+02 : f32
    %3 = vector.broadcast %cst : f32 to vector<2x1xf32>
    %4 = arith.divf %2, %3 : vector<2x1xf32>
    %c0_3 = arith.constant 0 : index
    %c0_4 = arith.constant 0 : index
    %5 = vector.load %arg3[%c0_3, %c0_4] : memref<62x128xf32, #tpu.memory_space<vmem>>, vector<60x128xf32>
    %c60 = arith.constant 60 : index
    %c0_5 = arith.constant 0 : index
    %6 = vector.load %arg3[%c60, %c0_5] : memref<62x128xf32, #tpu.memory_space<vmem>>, vector<1x128xf32>
    %c61 = arith.constant 61 : index
    %c0_6 = arith.constant 0 : index
    %7 = vector.load %arg3[%c61, %c0_6] : memref<62x128xf32, #tpu.memory_space<vmem>>, vector<1x128xf32>
    %cst_7 = arith.constant dense<0.000000e+00> : vector<2x128xf32>
    %8 = tpu.matmul %0, %5, %cst_7 {dimension_numbers = #tpu.dot_dimension_numbers<[1], [0], [0], [1], [0, 0, 1, 1], [], []>} : vector<2x60xf32>, vector<60x128xf32>, vector<2x128xf32> -> vector<2x128xf32>
    %9 = vector.broadcast %4 : vector<2x1xf32> to vector<2x128xf32>
    %10 = vector.broadcast %6 : vector<1x128xf32> to vector<2x128xf32>
    %11 = arith.mulf %9, %10 : vector<2x128xf32>
    %12 = arith.addf %8, %11 : vector<2x128xf32>
    %13 = vector.broadcast %7 : vector<1x128xf32> to vector<2x128xf32>
    %14 = arith.addf %12, %13 : vector<2x128xf32>
    %cst_8 = arith.constant 0.000000e+00 : f32
    %15 = vector.broadcast %cst_8 : f32 to vector<2x128xf32>
    %16 = arith.maximumf %14, %15 : vector<2x128xf32>
    %c0_9 = arith.constant 0 : index
    %c0_10 = arith.constant 0 : index
    %17 = vector.load %arg4[%c0_9, %c0_10] : memref<129x60xf32, #tpu.memory_space<vmem>>, vector<128x60xf32>
    %c128 = arith.constant 128 : index
    %c0_11 = arith.constant 0 : index
    %18 = vector.load %arg4[%c128, %c0_11] : memref<129x60xf32, #tpu.memory_space<vmem>>, vector<1x60xf32>
    %cst_12 = arith.constant dense<0.000000e+00> : vector<2x60xf32>
    %19 = tpu.matmul %16, %17, %cst_12 {dimension_numbers = #tpu.dot_dimension_numbers<[1], [0], [0], [1], [0, 0, 1, 1], [], []>} : vector<2x128xf32>, vector<128x60xf32>, vector<2x60xf32> -> vector<2x60xf32>
    %20 = vector.broadcast %18 : vector<1x60xf32> to vector<2x60xf32>
    %21 = arith.addf %19, %20 : vector<2x60xf32>
    %c0_13 = arith.constant 0 : index
    %c0_14 = arith.constant 0 : index
    %22 = vector.load %arg5[%c0_13, %c0_14] : memref<2x60xf32, #tpu.memory_space<vmem>>, vector<2x60xf32>
    tpu.vector_store %arg5[%c0_13, %c0_14], %21 {strides = array<i32>} : memref<2x60xf32, #tpu.memory_space<vmem>>, vector<2x60xf32>,
    return
  }
  func.func @transform_0(%arg0: i32) -> (i32, i32) {
    %c0_i32 = arith.constant 0 : i32
    %c0_i32_0 = arith.constant 0 : i32
    return %arg0, %c0_i32 : i32, i32
  }
  func.func @transform_1(%arg0: i32) -> (i32, i32) {
    %c0_i32 = arith.constant 0 : i32
    %c0_i32_0 = arith.constant 0 : i32
    return %arg0, %c0_i32 : i32, i32
  }
  func.func @transform_2(%arg0: i32) -> (i32, i32) {
    %c0_i32 = arith.constant 0 : i32
    %c0_i32_0 = arith.constant 0 : i32
    %c0_i32_1 = arith.constant 0 : i32
    return %c0_i32, %c0_i32_0 : i32, i32
  }
  func.func @transform_3(%arg0: i32) -> (i32, i32) {
    %c0_i32 = arith.constant 0 : i32
    %c0_i32_0 = arith.constant 0 : i32
    %c0_i32_1 = arith.constant 0 : i32
    return %c0_i32, %c0_i32_0 : i32, i32
  }
  func.func @transform_4(%arg0: i32) -> (i32, i32) {
    %c0_i32 = arith.constant 0 : i32
    %c0_i32_0 = arith.constant 0 : i32
    return %arg0, %c0_i32 : i32, i32
  }
}

</mosaic_0001>

<bundles_post_ra>
// kernel: tiny_diffuser_forward.1
= control target key start
LH: loop header
LB: loop body
LE: loop exit
PB: predicated region body
PF: predicated region fallthrough
CT: control target
= control target key end

     0   :  { %vm49_vm0 = vcmask 1043456   ;;  %v130_v2 = vmov 0   ;;  %v131_v3 = vmov 100.0   ;;  %vm45_vm2 = vcmask 490496   ;;  %s247_s2 = inlined_call_operand.vmem [shape: f32[62,128], index: 2, kind: input, shape index: {}]   ;;  %s248_s3 = inlined_call_operand.vmem [shape: f32[129,60], index: 3, kind: input, shape index: {}]   ;;  %s249_s1 = inlined_call_operand.vmem [shape: s32[2,1], index: 1, kind: input, shape index: {}]   ;;  %s250_s0 = inlined_call_operand.vmem [shape: f32[2,60], index: 0, kind: input, shape index: {}]   ;;  %s251_s4 = inlined_call_operand.vmem [shape: f32[2,60], index: 4, kind: output, shape index: {}]  }
   0x1   :  { %v35_v0 = vld [vmem:[%s247_s2 + $0x38] sm:$0xf]  ;;  %v34_v1 = vld [vmem:[%s247_s2 + $0x30] sm:$0xff]  ;;  %124 = vset.pattern.permute.xlu0 %v130_v2  ;;  %128 = vrcp.f32 %v131_v3  ;;  %v33_v4 = vld [vmem:[%s247_s2 + $0x28] sm:$0xff]  ;;  %vm114_vm3 = vcmask 484352  }
   0x2   :  { %120 = vmatpush.msk.msra.mxu0 %vm49_vm0, %v35_v0  ;;  %v91_v5 = vld [vmem:[%s248_s3 + $0x78] sm:$0xff]  ;;  %v90_v6 = vld [vmem:[%s248_s3 + $0x70] sm:$0xff]  ;;  %v32_v7 = vld [vmem:[%s247_s2 + $0x20] sm:$0xff] }
   0x3   :  { %94 = vmatpush.msra.mxu1 %v91_v5  ;;  %v89_v8 = vld [vmem:[%s248_s3 + $0x68] sm:$0xff]  ;;  %v31_v10 = vld [vmem:[%s247_s2 + $0x18] sm:$0xff]  ;;  %v88_v12 = vld [vmem:[%s248_s3 + $0x60] sm:$0xff] }
   0x4   :  { %62 = vmatpush.msra.mxu0 %v34_v1  ;;  %v30_v13 = vld [vmem:[%s247_s2 + $0x10] sm:$0xff]  ;;  %v18_v14 = vld [vmem:[%s249_s1] sm:$0x3]  ;;  %v87_v16 = vld [vmem:[%s248_s3 + $0x58] sm:$0xff] }
   0x5   :  { %95 = vmatpush.msra.mxu1 %v90_v6  ;;  %v29_v17 = vld [vmem:[%s247_s2 + $0x8] sm:$0xff]  ;;  %v86_v19 = vld [vmem:[%s248_s3 + $0x50] sm:$0xff]  ;;  %v28_v20 = vld [vmem:[%s247_s2] sm:$0xff]  ;;  %v19_v21 = vcvt.s32.f32 %v18_v14 }
   0x6   :  { %63 = vmatpush.msra.mxu0 %v33_v4  ;;  %v17_v22 = vld [vmem:[%s250_s0] sm:$0x3]  ;;  %v85_v24 = vld [vmem:[%s248_s3 + $0x48] sm:$0xff]  ;;  %v83_v28 = vld [vmem:[%s248_s3 + $0x38] sm:$0xff] }
   0x7   :  { %v129_v9 = vpop.eup %128  ;;  %96 = vmatpush.msra.mxu1 %v89_v8  ;;  %v84_v26 = vld [vmem:[%s248_s3 + $0x40] sm:$0xff]  ;;  %v82_v29 = vld [vmem:[%s248_s3 + $0x30] sm:$0xff]  ;;  %v81_v30 = vld [vmem:[%s248_s3 + $0x28] sm:$0xff] }
   0x8   :  { %64 = vmatpush.msra.mxu0 %v32_v7  ;;  %v21_v11 = vmul.f32 100.0, %v129_v9  ;;  %vm25_vm1 = vweird.f32 %v129_v9  ;;  %v80_v31 = vld [vmem:[%s248_s3 + $0x20] sm:$0xff]  ;;  %v79_v32 = vld [vmem:[%s248_s3 + $0x18] sm:$0xff]  ;;  %v78_v33 = vld [vmem:[%s248_s3 + $0x10] sm:$0xff] }
   0x9   :  { %97 = vmatpush.msra.mxu1 %v88_v12  ;;  %v77_v34 = vld [vmem:[%s248_s3 + $0x8] sm:$0xff]  ;;  %v76_v35 = vld [vmem:[%s248_s3] sm:$0xff]  ;;  %v125_v36 = vld [vmem:[%s247_s2 + $0x3c] ss:$0 sm:$0xff] }
   0xa   :  { %65 = vmatpush.msra.mxu0 %v31_v10  ;;  %v22_v15 = vsub.f32 1.0, %v21_v11  ;;  %v126_v39 = vld [vmem:[%s247_s2 + $0x3d] ss:$0 sm:$0xff]  ;;  %v127_v44 = vld [vmem:[%s248_s3 + $0x80] ss:$0 sm:$0xff] }
   0xb   :  { %98 = vmatpush.msra.mxu1 %v87_v16 }
   0xc   :  { %66 = vmatpush.msra.mxu0 %v30_v13  ;;  %v23_v18 = vmul.f32 %v129_v9, %v22_v15 }
   0xd   :  { %99 = vmatpush.msra.mxu1 %v86_v19 }
   0xe   :  { %67 = vmatpush.msra.mxu0 %v29_v17  ;;  %v24_v23 = vadd.f32 %v129_v9, %v23_v18 }
   0xf   :  { %100 = vmatpush.msra.mxu1 %v85_v24 }
  0x10   :  { %68 = vmatpush.msra.mxu0 %v28_v20  ;;  %v26_v25 = vsel %vm25_vm1, %v129_v9, %v24_v23 }
  0x11   :  { %121 = vmatmul.msk.f32.vlgmr.msra.gmra.mxu0 %vm45_vm2, %v17_v22  ;;  %v27_v27 = vmul.f32 %v26_v25, %v19_v21  ;;  %101 = vmatpush.msra.mxu1 %v84_v26 }
  0x13   :  { %40 = vperm.xlu0 %124, %v27_v27   ;;  %102 = vmatpush.msra.mxu1 %v83_v28 }
  0x15   :  { %103 = vmatpush.msra.mxu1 %v82_v29 }
  0x17   :  { %104 = vmatpush.msra.mxu1 %v81_v30 }
  0x19   :  { %105 = vmatpush.msra.mxu1 %v80_v31 }
  0x1b   :  { %106 = vmatpush.msra.mxu1 %v79_v32 }
  0x1d   :  { %107 = vmatpush.msra.mxu1 %v78_v33 }
  0x1f   :  { %108 = vmatpush.msra.mxu1 %v77_v34 }
  0x21   :  { %109 = vmatpush.msra.mxu1 %v76_v35 }
  0x85   :  { %v41_v37 = vpop.permute.xlu0 %40 }
  0x86   :  { %v44_v38 = vmul.f32 %v125_v36, %v41_v37 }
  0x8e   :  { %v70_v40 = vpop.f32.mrf.mxu0 }
  0x8f   :  { %v71_v41 = vadd.f32 %v70_v40, %v44_v38 }
  0x91   :  { %v74_v42 = vadd.f32 %v126_v39, %v71_v41 }
  0x93   :  { %v75_v43 = vmax.f32 %v74_v42, 0.0 }
  0x95   :  { %110 = vmatmul.f32.vlgmr.msra.gmra.mxu1 %v75_v43 }
 0x112   :  { %v111_v45 = vpop.f32.mrf.mxu1 }
 0x113   :  { %v112_v46 = vadd.f32 %v127_v44, %v111_v45 }
 0x115   :  { %115 = vst.msk [vmem:[%s251_s4] sm:$0x3] %vm114_vm3, %v112_v46 }

</bundles_post_ra>
